<compile_context>
chip_gen: v7x
topology: tpu7x:2x2x1
jax: 0.10.0
libtpu: 0.0.40
codegen_flags: <defaults>
</compile_context>

<pallas_src>
import numpy as np
import jax
import jax.numpy as jnp
from jax import lax
from jax.experimental import pallas as pl
from jax.experimental.pallas import tpu as pltpu

_LN10 = float(np.log(10.0))
_EPS = 1e-10  # meter eps, used identically in kernel and reference


def _make_fused_kernel(R, hop, block_rows, num_hops, inv_n, lo, hi,
                       inc_db, dec_db, rp1, rm1):
    """Static params:
       lo/hi = 10**((target -/+ thresh)/10)      (power thresholds, no log in loop)
       rp1   = 10**( inc/20), rm1 = 10**(-dec/20) (per-block amplitude steps)
    """
    B = block_rows

    def kernel(x_ref, rp_ref, rm_ref, o_ref,
               s0_ref, sp_ref, sm_ref, amp_ref, ring_ref, state_ref):
        step = pl.program_id(0)

        @pl.when(step == 0)
        def _():
            ring_ref[...] = jnp.zeros_like(ring_ref)     # modified-energy ring
            state_ref[...] = jnp.ones_like(state_ref)    # carried amplitude = 1

        # ---------------- vector phase: per-row weighted energies ----------
        x = x_ref[...]                                   # (R, hop) f32
        xsq = x * x
        rp = rp_ref[...]                                 # (1, hop) 10^( inc*ramp/20)
        rm = rm_ref[...]                                 # (1, hop) 10^(-dec*ramp/20)
        s0_ref[...] = jnp.sum(xsq, axis=1, keepdims=True)
        sp_ref[...] = jnp.sum(xsq * (rp * rp), axis=1, keepdims=True)
        sm_ref[...] = jnp.sum(xsq * (rm * rm), axis=1, keepdims=True)

        # ---------------- serial phase: gain feedback -----------------------
        g0 = step * R
        scale0 = state_ref[0:1, 0:1]                     # (1,1) carried amplitude
        # Exact window re-sum at every chunk boundary (kills fp32 drift):
        # ring holds modified energies of the last B processed rows; the row
        # that left the window sits in slot g0 % B.
        wsum0 = (jnp.sum(ring_ref[:, 0:1], axis=0, keepdims=True)
                 - ring_ref[pl.ds(g0 % B, 1), 0:1])      # (1,1)

        def body(r, carry):
            scale, wsum = carry                          # (1,1) each
            g = g0 + r                                   # global row index
            s0 = s0_ref[pl.ds(r, 1), 0:1]
            sp = sp_ref[pl.ds(r, 1), 0:1]
            sm = sm_ref[pl.ds(r, 1), 0:1]
            old = ring_ref[pl.ds((g + 1) % B, 1), 0:1]   # row g-B+1 (or 0)

            scale2 = scale * scale
            # block power of rows [g-B+1, g] measured on the gain-modified
            # signal, folded with the current gain:  (P + eps) * scale^2
            p = ((wsum + s0) * inv_n + _EPS) * scale2
            is_block = jnp.logical_and(g >= B - 1, g < num_hops)
            delta = jnp.where(jnp.logical_and(is_block, p < lo), inc_db,
                              jnp.where(jnp.logical_and(is_block, p > hi),
                                        -dec_db, 0.0)).astype(jnp.float32)

            # energy of row g after its gain ramp (for future windows)
            s_sel = jnp.where(delta > 0.0, sp,
                              jnp.where(delta < 0.0, sm, s0))
            mod = jnp.where(is_block, scale2 * s_sel, s0)
            scale_row = jnp.where(is_block, scale, 1.0)

            # final per-row amplitude ramp, consumed by the dense apply
            amp_row = scale_row * jnp.where(delta > 0.0, rp,
                                            jnp.where(delta < 0.0, rm, 1.0))
            amp_ref[pl.ds(r, 1), :] = amp_row
            ring_ref[pl.ds(g % B, 1), :] = jnp.broadcast_to(mod, (1, 128))

            wsum_next = wsum - old + mod
            scale_next = scale * jnp.where(delta > 0.0, rp1,
                                           jnp.where(delta < 0.0, rm1, 1.0))
            return scale_next, wsum_next

        scale_fin, _ = lax.fori_loop(0, R, body, (scale0, wsum0))
        state_ref[...] = jnp.broadcast_to(scale_fin, state_ref.shape)

        # ---------------- vector phase: apply + clip ------------------------
        o_ref[...] = jnp.clip(x_ref[...] * amp_ref[...], -1.0, 1.0)

    return kernel


def _round_up(a, m):
    return (a + m - 1) // m * m


def feed_forward_loudness_control(
    x,
    *,
    sample_rate,
    hop_length,
    block_length_in_seconds=0.4,
    target_loudness=-23.0,
    target_loudness_treshold=0.5,
    increase_per_second=10.0,
    decrease_per_second=10.0,
    chunk_rows=1024,
):
    T = int(x.shape[0])
    # librosa.time_to_samples(times, sr) == int(times * sr)
    block_len = int(block_length_in_seconds * sample_rate)
    assert T % hop_length == 0, "demo requires T to be a multiple of hop_length"
    assert block_len % hop_length == 0, "demo requires block_len multiple of hop_length"
    assert hop_length % 128 == 0, "hop_length maps to the lane axis"

    hop = hop_length
    num_hops = T // hop
    block_rows = block_len // hop
    assert block_rows >= 2, "block must span at least two hops"

    inc = hop / sample_rate * increase_per_second     # dB increase per block
    dec = hop / sample_rate * decrease_per_second     # dB decrease per block

    # Chunk size: multiple of 8 rows, capped for VMEM, signal zero-padded to a
    # multiple of it (padded rows have zero energy and are sliced off again).
    R = min(int(chunk_rows), _round_up(num_hops, 8), 4096)
    R = max(8, R - (R % 8))
    num_hops_pad = _round_up(num_hops, R)
    grid = (num_hops_pad // R,)

    xf = x.astype(jnp.float32)
    if num_hops_pad * hop > T:
        xf = jnp.pad(xf, (0, num_hops_pad * hop - T))
    x2d = xf.reshape(num_hops_pad, hop)

    # torch.linspace(gain, gain_next, hop) ramp (endpoints included) turned
    # into the two possible amplitude factor rows, computed once in JAX.
    ramp = (jnp.arange(hop, dtype=jnp.float32) / float(hop - 1)).reshape(1, hop)
    rp = jnp.exp(ramp * (inc * _LN10 / 20.0))     # 10**( inc*ramp/20)
    rm = jnp.exp(ramp * (-dec * _LN10 / 20.0))    # 10**(-dec*ramp/20)

    # Static scalars for the serial feedback (no log on the critical path):
    lo = float(10.0 ** ((target_loudness - target_loudness_treshold) / 10.0))
    hi = float(10.0 ** ((target_loudness + target_loudness_treshold) / 10.0))
    inv_n = 1.0 / float(block_rows * hop)
    rp1 = float(10.0 ** (inc / 20.0))
    rm1 = float(10.0 ** (-dec / 20.0))

    kernel = _make_fused_kernel(R, hop, block_rows, num_hops, inv_n, lo, hi,
                                float(inc), float(dec), rp1, rm1)

    out2d = pl.pallas_call(
        kernel,
        out_shape=jax.ShapeDtypeStruct((num_hops_pad, hop), jnp.float32),
        grid=grid,
        in_specs=[pl.BlockSpec((R, hop), lambda i: (i, 0)),
                  pl.BlockSpec((1, hop), lambda i: (0, 0)),
                  pl.BlockSpec((1, hop), lambda i: (0, 0))],
        out_specs=pl.BlockSpec((R, hop), lambda i: (i, 0)),
        scratch_shapes=[
            pltpu.VMEM((R, 1), jnp.float32),             # s0: sum(x^2)
            pltpu.VMEM((R, 1), jnp.float32),             # sp: +inc weighted
            pltpu.VMEM((R, 1), jnp.float32),             # sm: -dec weighted
            pltpu.VMEM((R, hop), jnp.float32),           # per-row amplitude map
            pltpu.VMEM((block_rows, 128), jnp.float32),  # modified-energy ring
            pltpu.VMEM((1, 128), jnp.float32),           # carried amplitude
        ],
        input_output_aliases={0: 0},
        compiler_params=pltpu.CompilerParams(
            dimension_semantics=("arbitrary",),
            vmem_limit_bytes=32 * 1024 * 1024),
    )(x2d, rp, rm)

    return out2d[:num_hops].reshape(T)


def _reference(x, *, sample_rate, hop_length, block_length_in_seconds=0.4,
               target_loudness=-23.0, target_loudness_treshold=0.5,
               increase_per_second=10.0, decrease_per_second=10.0):
    """NumPy transcription of the PyTorch forward (with the RMS-dB meter_func)."""
    out = np.asarray(x, dtype=np.float64).copy()
    T = out.shape[0]
    block_len = int(block_length_in_seconds * sample_rate)
    inc = hop_length / sample_rate * increase_per_second
    dec = hop_length / sample_rate * decrease_per_second
    gain = 0.0
    for start in range(0, T, hop_length):
        end = start + block_len
        if end <= T:
            block = out[start:end]
            loudness = 10.0 * np.log10(np.mean(block ** 2) + _EPS)
            error = loudness - target_loudness
            if error + gain < -target_loudness_treshold:
                gain_next = gain + inc
            elif error + gain > target_loudness_treshold:
                gain_next = gain - dec
            else:
                gain_next = gain
            gain_map = np.linspace(gain, gain_next, hop_length)
            out[end - hop_length:end] *= 10.0 ** (gain_map / 20.0)
            gain = gain_next
        else:
            out[start + block_len - hop_length:] *= 10.0 ** (gain / 20.0)
    np.clip(out, -1.0, 1.0, out=out)
    return out


if __name__ == "__main__":
    # Small, consistent shapes: 1-D waveform, T = 2048 samples.
    sample_rate = 640       # -> block_length_in_samples = 0.4 * 640 = 256 = 2 hops
    hop_length = 128        # -> increase/decrease per block = 128/640*10 = 2.0 dB
    T = 2048

    key = jax.random.PRNGKey(0)
    x = 0.1 * jax.random.normal(key, (T,), dtype=jnp.float32)
    x_np = np.asarray(x).copy()   # snapshot before the kernel (output aliases x2d)

    out = feed_forward_loudness_control(
        x, sample_rate=sample_rate, hop_length=hop_length,
        chunk_rows=8)             # small chunks so the demo exercises grid=(2,)
                                  # and the cross-chunk state carry
    out = jax.block_until_ready(out)

    ref = _reference(x_np, sample_rate=sample_rate, hop_length=hop_length)
    out64 = np.asarray(out, dtype=np.float64)
    if not np.allclose(out64, ref, rtol=1e-3, atol=1e-3):
        raise AssertionError(
            "mismatch vs reference, max abs err = %g"
            % float(np.max(np.abs(out64 - ref))))

    print("KERNEL_OK")
</pallas_src>

<mosaic_0001>
module attributes {stable_mosaic.version = 11 : i64} {
  func.func @kernel(%arg0: i32, %arg1: memref<8x128xf32, #tpu.memory_space<vmem>>, %arg2: memref<1x128xf32, #tpu.memory_space<vmem>>, %arg3: memref<1x128xf32, #tpu.memory_space<vmem>>, %arg4: memref<8x128xf32, #tpu.memory_space<vmem>>, %arg5: memref<8x1xf32, #tpu.memory_space<vmem>>, %arg6: memref<8x1xf32, #tpu.memory_space<vmem>>, %arg7: memref<8x1xf32, #tpu.memory_space<vmem>>, %arg8: memref<8x128xf32, #tpu.memory_space<vmem>>, %arg9: memref<2x128xf32, #tpu.memory_space<vmem>>, %arg10: memref<1x128xf32, #tpu.memory_space<vmem>>) attributes {dimension_semantics = [#tpu.dimension_semantics<arbitrary>], iteration_bounds = array<i64: 2>, scalar_prefetch = 0 : i64, scratch_operands = 6 : i64, tpu.core_type = #tpu.core_type<tc>, window_params = [{transform_indices = @transform_0, window_bounds = array<i64: 8, 128>}, {pipeline_mode = #tpu.pipeline_mode<synchronous>, transform_indices = @transform_1, window_bounds = array<i64: 1, 128>}, {pipeline_mode = #tpu.pipeline_mode<synchronous>, transform_indices = @transform_2, window_bounds = array<i64: 1, 128>}, {transform_indices = @transform_3, window_bounds = array<i64: 8, 128>}]} {
    %c0_i32 = arith.constant 0 : i32
    %0 = arith.cmpi eq, %arg0, %c0_i32 : i32
    %1 = arith.extui %0 : i1 to i32
    %c0_i32_0 = arith.constant 0 : i32
    %2 = arith.cmpi ne, %1, %c0_i32_0 : i32
    scf.if %2 {
      %cst_38 = arith.constant 0.000000e+00 : f32
      %53 = vector.broadcast %cst_38 : f32 to vector<2x128xf32>
      %c0_39 = arith.constant 0 : index
      %c0_40 = arith.constant 0 : index
      %54 = vector.load %arg9[%c0_39, %c0_40] : memref<2x128xf32, #tpu.memory_space<vmem>>, vector<2x128xf32>
      tpu.vector_store %arg9[%c0_39, %c0_40], %53 {strides = array<i32>} : memref<2x128xf32, #tpu.memory_space<vmem>>, vector<2x128xf32>,
      %cst_41 = arith.constant 1.000000e+00 : f32
      %55 = vector.broadcast %cst_41 : f32 to vector<1x128xf32>
      %c0_42 = arith.constant 0 : index
      %c0_43 = arith.constant 0 : index
      %56 = vector.load %arg10[%c0_42, %c0_43] : memref<1x128xf32, #tpu.memory_space<vmem>>, vector<1x128xf32>
      tpu.vector_store %arg10[%c0_42, %c0_43], %55 {strides = array<i32>} : memref<1x128xf32, #tpu.memory_space<vmem>>, vector<1x128xf32>,
    } else {
    }
    %c0 = arith.constant 0 : index
    %c0_1 = arith.constant 0 : index
    %3 = vector.load %arg1[%c0, %c0_1] : memref<8x128xf32, #tpu.memory_space<vmem>>, vector<8x128xf32>
    %4 = arith.mulf %3, %3 : vector<8x128xf32>
    %c0_2 = arith.constant 0 : index
    %c0_3 = arith.constant 0 : index
    %5 = vector.load %arg2[%c0_2, %c0_3] : memref<1x128xf32, #tpu.memory_space<vmem>>, vector<1x128xf32>
    %c0_4 = arith.constant 0 : index
    %c0_5 = arith.constant 0 : index
    %6 = vector.load %arg3[%c0_4, %c0_5] : memref<1x128xf32, #tpu.memory_space<vmem>>, vector<1x128xf32>
    %cst = arith.constant dense<0.000000e+00> : vector<8xf32>
    %7 = vector.multi_reduction <add>, %4, %cst [1] : vector<8x128xf32> to vector<8xf32>
    %8 = vector.shape_cast %7 : vector<8xf32> to vector<8x1xf32>
    %c0_6 = arith.constant 0 : index
    %c0_7 = arith.constant 0 : index
    %9 = vector.load %arg5[%c0_6, %c0_7] : memref<8x1xf32, #tpu.memory_space<vmem>>, vector<8x1xf32>
    tpu.vector_store %arg5[%c0_6, %c0_7], %8 {strides = array<i32>} : memref<8x1xf32, #tpu.memory_space<vmem>>, vector<8x1xf32>,
    %10 = arith.mulf %5, %5 : vector<1x128xf32>
    %11 = vector.broadcast %10 : vector<1x128xf32> to vector<8x128xf32>
    %12 = arith.mulf %4, %11 : vector<8x128xf32>
    %cst_8 = arith.constant dense<0.000000e+00> : vector<8xf32>
    %13 = vector.multi_reduction <add>, %12, %cst_8 [1] : vector<8x128xf32> to vector<8xf32>
    %14 = vector.shape_cast %13 : vector<8xf32> to vector<8x1xf32>
    %c0_9 = arith.constant 0 : index
    %c0_10 = arith.constant 0 : index
    %15 = vector.load %arg6[%c0_9, %c0_10] : memref<8x1xf32, #tpu.memory_space<vmem>>, vector<8x1xf32>
    tpu.vector_store %arg6[%c0_9, %c0_10], %14 {strides = array<i32>} : memref<8x1xf32, #tpu.memory_space<vmem>>, vector<8x1xf32>,
    %16 = arith.mulf %6, %6 : vector<1x128xf32>
    %17 = vector.broadcast %16 : vector<1x128xf32> to vector<8x128xf32>
    %18 = arith.mulf %4, %17 : vector<8x128xf32>
    %cst_11 = arith.constant dense<0.000000e+00> : vector<8xf32>
    %19 = vector.multi_reduction <add>, %18, %cst_11 [1] : vector<8x128xf32> to vector<8xf32>
    %20 = vector.shape_cast %19 : vector<8xf32> to vector<8x1xf32>
    %c0_12 = arith.constant 0 : index
    %c0_13 = arith.constant 0 : index
    %21 = vector.load %arg7[%c0_12, %c0_13] : memref<8x1xf32, #tpu.memory_space<vmem>>, vector<8x1xf32>
    tpu.vector_store %arg7[%c0_12, %c0_13], %20 {strides = array<i32>} : memref<8x1xf32, #tpu.memory_space<vmem>>, vector<8x1xf32>,
    %c8_i32 = arith.constant 8 : i32
    %22 = arith.muli %arg0, %c8_i32 : i32
    %c0_14 = arith.constant 0 : index
    %c0_15 = arith.constant 0 : index
    %23 = vector.load %arg10[%c0_14, %c0_15] : memref<1x128xf32, #tpu.memory_space<vmem>>, vector<1x1xf32>
    %c0_16 = arith.constant 0 : index
    %c0_17 = arith.constant 0 : index
    %24 = vector.load %arg9[%c0_16, %c0_17] : memref<2x128xf32, #tpu.memory_space<vmem>>, vector<2x1xf32>
    %cst_18 = arith.constant dense<0.000000e+00> : vector<1xf32>
    %25 = vector.multi_reduction <add>, %24, %cst_18 [0] : vector<2x1xf32> to vector<1xf32>
    %26 = vector.shape_cast %25 : vector<1xf32> to vector<1x1xf32>
    %c2_i32 = arith.constant 2 : i32
    %c0_i32_19 = arith.constant 0 : i32
    %27 = arith.cmpi eq, %c2_i32, %c0_i32_19 : i32
    %c1_i32 = arith.constant 1 : i32
    %28 = arith.select %27, %c1_i32, %c2_i32 : i32
    %29 = arith.remsi %22, %28 : i32
    %c0_i32_20 = arith.constant 0 : i32
    %30 = arith.cmpi ne, %29, %c0_i32_20 : i32
    %c0_i32_21 = arith.constant 0 : i32
    %31 = arith.cmpi slt, %29, %c0_i32_21 : i32
    %c0_i32_22 = arith.constant 0 : i32
    %32 = arith.cmpi slt, %28, %c0_i32_22 : i32
    %33 = arith.xori %31, %32 : i1
    %34 = arith.andi %33, %30 : i1
    %35 = arith.addi %29, %28 : i32
    %36 = arith.select %34, %35, %29 : i32
    %37 = arith.index_cast %36 : i32 to index
    %c0_23 = arith.constant 0 : index
    %38 = vector.load %arg9[%37, %c0_23] : memref<2x128xf32, #tpu.memory_space<vmem>>, vector<1x1xf32>
    %39 = arith.subf %26, %38 : vector<1x1xf32>
    %c0_i32_24 = arith.constant 0 : i32
    %c8_i32_25 = arith.constant 8 : i32
    %40 = arith.addi %c0_i32_24, %c8_i32_25 : i32
    %c1_i32_26 = arith.constant 1 : i32
    %41:2 = scf.for %arg11 = %c0_i32_24 to %40 step %c1_i32_26 iter_args(%arg12 = %23, %arg13 = %39) -> (vector<1x1xf32>, vector<1x1xf32>)  : i32 {
      %53 = arith.addi %22, %arg11 : i32
      %54 = arith.index_cast %arg11 : i32 to index
      %c0_38 = arith.constant 0 : index
      %55 = vector.load %arg5[%54, %c0_38] : memref<8x1xf32, #tpu.memory_space<vmem>>, vector<1x1xf32>
      %56 = arith.index_cast %arg11 : i32 to index
      %c0_39 = arith.constant 0 : index
      %57 = vector.load %arg6[%56, %c0_39] : memref<8x1xf32, #tpu.memory_space<vmem>>, vector<1x1xf32>
      %58 = arith.index_cast %arg11 : i32 to index
      %c0_40 = arith.constant 0 : index
      %59 = vector.load %arg7[%58, %c0_40] : memref<8x1xf32, #tpu.memory_space<vmem>>, vector<1x1xf32>
      %c1_i32_41 = arith.constant 1 : i32
      %60 = arith.addi %53, %c1_i32_41 : i32
      %c2_i32_42 = arith.constant 2 : i32
      %c0_i32_43 = arith.constant 0 : i32
      %61 = arith.cmpi eq, %c2_i32_42, %c0_i32_43 : i32
      %c1_i32_44 = arith.constant 1 : i32
      %62 = arith.select %61, %c1_i32_44, %c2_i32_42 : i32
      %63 = arith.remsi %60, %62 : i32
      %c0_i32_45 = arith.constant 0 : i32
      %64 = arith.cmpi ne, %63, %c0_i32_45 : i32
      %c0_i32_46 = arith.constant 0 : i32
      %65 = arith.cmpi slt, %63, %c0_i32_46 : i32
      %c0_i32_47 = arith.constant 0 : i32
      %66 = arith.cmpi slt, %62, %c0_i32_47 : i32
      %67 = arith.xori %65, %66 : i1
      %68 = arith.andi %67, %64 : i1
      %69 = arith.addi %63, %62 : i32
      %70 = arith.select %68, %69, %63 : i32
      %71 = arith.index_cast %70 : i32 to index
      %c0_48 = arith.constant 0 : index
      %72 = vector.load %arg9[%71, %c0_48] : memref<2x128xf32, #tpu.memory_space<vmem>>, vector<1x1xf32>
      %73 = arith.mulf %arg12, %arg12 : vector<1x1xf32>
      %74 = arith.addf %arg13, %55 : vector<1x1xf32>
      %cst_49 = arith.constant 3.906250e-03 : f32
      %75 = vector.broadcast %cst_49 : f32 to vector<1x1xf32>
      %76 = arith.mulf %74, %75 : vector<1x1xf32>
      %cst_50 = arith.constant 1.000000e-10 : f32
      %77 = vector.broadcast %cst_50 : f32 to vector<1x1xf32>
      %78 = arith.addf %76, %77 : vector<1x1xf32>
      %79 = arith.mulf %78, %73 : vector<1x1xf32>
      %c1_i32_51 = arith.constant 1 : i32
      %80 = arith.cmpi sge, %53, %c1_i32_51 : i32
      %c16_i32 = arith.constant 16 : i32
      %81 = arith.cmpi slt, %53, %c16_i32 : i32
      %82 = arith.andi %80, %81 : i1
      %cst_52 = arith.constant 0.00446683588 : f32
      %83 = vector.broadcast %cst_52 : f32 to vector<1x1xf32>
      %84 = arith.cmpf olt, %79, %83 : vector<1x1xf32>
      %85 = vector.broadcast %82 : i1 to vector<1x1xi1>
      %86 = arith.andi %85, %84 : vector<1x1xi1>
      %cst_53 = arith.constant 0.00562341325 : f32
      %87 = vector.broadcast %cst_53 : f32 to vector<1x1xf32>
      %88 = arith.cmpf ogt, %79, %87 : vector<1x1xf32>
      %89 = vector.broadcast %82 : i1 to vector<1x1xi1>
      %90 = arith.andi %89, %88 : vector<1x1xi1>
      %cst_54 = arith.constant -2.000000e+00 : f32
      %cst_55 = arith.constant 0.000000e+00 : f32
      %91 = vector.broadcast %cst_54 : f32 to vector<1x1xf32>
      %92 = vector.broadcast %cst_55 : f32 to vector<1x1xf32>
      %93 = arith.select %90, %91, %92 : vector<1x1xi1>, vector<1x1xf32>
      %cst_56 = arith.constant 2.000000e+00 : f32
      %94 = vector.broadcast %cst_56 : f32 to vector<1x1xf32>
      %95 = arith.select %86, %94, %93 : vector<1x1xi1>, vector<1x1xf32>
      %cst_57 = arith.constant 0.000000e+00 : f32
      %96 = vector.broadcast %cst_57 : f32 to vector<1x1xf32>
      %97 = arith.cmpf ogt, %95, %96 : vector<1x1xf32>
      %cst_58 = arith.constant 0.000000e+00 : f32
      %98 = vector.broadcast %cst_58 : f32 to vector<1x1xf32>
      %99 = arith.cmpf olt, %95, %98 : vector<1x1xf32>
      %100 = arith.select %99, %59, %55 : vector<1x1xi1>, vector<1x1xf32>
      %101 = arith.select %97, %57, %100 : vector<1x1xi1>, vector<1x1xf32>
      %102 = arith.mulf %73, %101 : vector<1x1xf32>
      %103 = arith.select %82, %102, %55 : vector<1x1xf32>
      %cst_59 = arith.constant 1.000000e+00 : f32
      %104 = vector.broadcast %cst_59 : f32 to vector<1x1xf32>
      %105 = arith.select %82, %arg12, %104 : vector<1x1xf32>
      %cst_60 = arith.constant 0.000000e+00 : f32
      %106 = vector.broadcast %cst_60 : f32 to vector<1x1xf32>
      %107 = arith.cmpf ogt, %95, %106 : vector<1x1xf32>
      %cst_61 = arith.constant 0.000000e+00 : f32
      %108 = vector.broadcast %cst_61 : f32 to vector<1x1xf32>
      %109 = arith.cmpf olt, %95, %108 : vector<1x1xf32>
      %cst_62 = arith.constant 1.000000e+00 : f32
      %110 = vector.shape_cast %109 : vector<1x1xi1> to vector<1x1xi1>
      %111 = vector.broadcast %110 : vector<1x1xi1> to vector<1x128xi1>
      %112 = vector.broadcast %cst_62 : f32 to vector<1x128xf32>
      %113 = arith.select %111, %6, %112 : vector<1x128xi1>, vector<1x128xf32>
      %114 = vector.shape_cast %107 : vector<1x1xi1> to vector<1x1xi1>
      %115 = vector.broadcast %114 : vector<1x1xi1> to vector<1x128xi1>
      %116 = arith.select %115, %5, %113 : vector<1x128xi1>, vector<1x128xf32>
      %117 = vector.broadcast %105 : vector<1x1xf32> to vector<1x128xf32>
      %118 = arith.mulf %117, %116 : vector<1x128xf32>
      %119 = arith.index_cast %arg11 : i32 to index
      %c0_63 = arith.constant 0 : index
      %120 = vector.load %arg8[%119, %c0_63] : memref<8x128xf32, #tpu.memory_space<vmem>>, vector<1x128xf32>
      tpu.vector_store %arg8[%119, %c0_63], %118 {strides = array<i32>} : memref<8x128xf32, #tpu.memory_space<vmem>>, vector<1x128xf32>,
      %121 = vector.shape_cast %103 : vector<1x1xf32> to vector<1x1xf32>
      %122 = vector.broadcast %121 : vector<1x1xf32> to vector<1x128xf32>
      %c2_i32_64 = arith.constant 2 : i32
      %c0_i32_65 = arith.constant 0 : i32
      %123 = arith.cmpi eq, %c2_i32_64, %c0_i32_65 : i32
      %c1_i32_66 = arith.constant 1 : i32
      %124 = arith.select %123, %c1_i32_66, %c2_i32_64 : i32
      %125 = arith.remsi %53, %124 : i32
      %c0_i32_67 = arith.constant 0 : i32
      %126 = arith.cmpi ne, %125, %c0_i32_67 : i32
      %c0_i32_68 = arith.constant 0 : i32
      %127 = arith.cmpi slt, %125, %c0_i32_68 : i32
      %c0_i32_69 = arith.constant 0 : i32
      %128 = arith.cmpi slt, %124, %c0_i32_69 : i32
      %129 = arith.xori %127, %128 : i1
      %130 = arith.andi %129, %126 : i1
      %131 = arith.addi %125, %124 : i32
      %132 = arith.select %130, %131, %125 : i32
      %133 = arith.index_cast %132 : i32 to index
      %c0_70 = arith.constant 0 : index
      %134 = vector.load %arg9[%133, %c0_70] : memref<2x128xf32, #tpu.memory_space<vmem>>, vector<1x128xf32>
      tpu.vector_store %arg9[%133, %c0_70], %122 {strides = array<i32>} : memref<2x128xf32, #tpu.memory_space<vmem>>, vector<1x128xf32>,
      %135 = arith.subf %arg13, %72 : vector<1x1xf32>
      %136 = arith.addf %135, %103 : vector<1x1xf32>
      %cst_71 = arith.constant 0.000000e+00 : f32
      %137 = vector.broadcast %cst_71 : f32 to vector<1x1xf32>
      %138 = arith.cmpf ogt, %95, %137 : vector<1x1xf32>
      %cst_72 = arith.constant 0.000000e+00 : f32
      %139 = vector.broadcast %cst_72 : f32 to vector<1x1xf32>
      %140 = arith.cmpf olt, %95, %139 : vector<1x1xf32>
      %cst_73 = arith.constant 0.794328212 : f32
      %cst_74 = arith.constant 1.000000e+00 : f32
      %141 = vector.broadcast %cst_73 : f32 to vector<1x1xf32>
      %142 = vector.broadcast %cst_74 : f32 to vector<1x1xf32>
      %143 = arith.select %140, %141, %142 : vector<1x1xi1>, vector<1x1xf32>
      %cst_75 = arith.constant 1.25892544 : f32
      %144 = vector.broadcast %cst_75 : f32 to vector<1x1xf32>
      %145 = arith.select %138, %144, %143 : vector<1x1xi1>, vector<1x1xf32>
      %146 = arith.mulf %arg12, %145 : vector<1x1xf32>
      scf.yield %146, %136 : vector<1x1xf32>, vector<1x1xf32>
    }
    %c8_i32_27 = arith.constant 8 : i32
    %42 = vector.shape_cast %41#0 : vector<1x1xf32> to vector<1x1xf32>
    %43 = vector.broadcast %42 : vector<1x1xf32> to vector<1x128xf32>
    %c0_28 = arith.constant 0 : index
    %c0_29 = arith.constant 0 : index
    %44 = vector.load %arg10[%c0_28, %c0_29] : memref<1x128xf32, #tpu.memory_space<vmem>>, vector<1x128xf32>
    tpu.vector_store %arg10[%c0_28, %c0_29], %43 {strides = array<i32>} : memref<1x128xf32, #tpu.memory_space<vmem>>, vector<1x128xf32>,
    %c0_30 = arith.constant 0 : index
    %c0_31 = arith.constant 0 : index
    %45 = vector.load %arg1[%c0_30, %c0_31] : memref<8x128xf32, #tpu.memory_space<vmem>>, vector<8x128xf32>
    %c0_32 = arith.constant 0 : index
    %c0_33 = arith.constant 0 : index
    %46 = vector.load %arg8[%c0_32, %c0_33] : memref<8x128xf32, #tpu.memory_space<vmem>>, vector<8x128xf32>
    %47 = arith.mulf %45, %46 : vector<8x128xf32>
    %cst_34 = arith.constant -1.000000e+00 : f32
    %cst_35 = arith.constant 1.000000e+00 : f32
    %48 = vector.broadcast %cst_34 : f32 to vector<8x128xf32>
    %49 = arith.maximumf %48, %47 : vector<8x128xf32>
    %50 = vector.broadcast %cst_35 : f32 to vector<8x128xf32>
    %51 = arith.minimumf %50, %49 : vector<8x128xf32>
    %c0_36 = arith.constant 0 : index
    %c0_37 = arith.constant 0 : index
    %52 = vector.load %arg4[%c0_36, %c0_37] : memref<8x128xf32, #tpu.memory_space<vmem>>, vector<8x128xf32>
    tpu.vector_store %arg4[%c0_36, %c0_37], %51 {strides = array<i32>} : memref<8x128xf32, #tpu.memory_space<vmem>>, vector<8x128xf32>,
    return
  }
  func.func @transform_0(%arg0: i32) -> (i32, i32) {
    %c0_i32 = arith.constant 0 : i32
    %c0_i32_0 = arith.constant 0 : i32
    return %arg0, %c0_i32 : i32, i32
  }
  func.func @transform_1(%arg0: i32) -> (i32, i32) {
    %c0_i32 = arith.constant 0 : i32
    %c0_i32_0 = arith.constant 0 : i32
    %c0_i32_1 = arith.constant 0 : i32
    return %c0_i32, %c0_i32_0 : i32, i32
  }
  func.func @transform_2(%arg0: i32) -> (i32, i32) {
    %c0_i32 = arith.constant 0 : i32
    %c0_i32_0 = arith.constant 0 : i32
    %c0_i32_1 = arith.constant 0 : i32
    return %c0_i32, %c0_i32_0 : i32, i32
  }
  func.func @transform_3(%arg0: i32) -> (i32, i32) {
    %c0_i32 = arith.constant 0 : i32
    %c0_i32_0 = arith.constant 0 : i32
    return %arg0, %c0_i32 : i32, i32
  }
}

</mosaic_0001>

<bundles_post_ra>
// kernel: tpu_custom_call.1
= control target key start
LH: loop header
LB: loop body
LE: loop exit
PB: predicated region body
PF: predicated region fallthrough
CT: control target
= control target key end

     0   :  { %8 = vsyncpa [#allocation9], 0  ;;  %s962_s0 = inlined_call_operand.hbm [shape: f32[16,128], index: 0, kind: input, shape index: {}, may-alias: {0,3}]   ;;  %s963_s1 = inlined_call_operand.vmem [shape: f32[1,128], index: 1, kind: input, shape index: {}]   ;;  %s964_s2 = inlined_call_operand.vmem [shape: f32[1,128], index: 2, kind: input, shape index: {}]   ;;  %s965_s3 = inlined_call_operand.hbm [shape: f32[16,128], index: 3, kind: output, shape index: {}, may-alias: {0,3}]  }
   0x1   :  { %10 = vsyncpa [#allocation9 + $0x1], 0 }
   0x2   :  { %11 = vsyncpa [#allocation10], 0 }
   0x3   :  { %13 = vsyncpa [#allocation10 + $0x1], 0  ;;  %s727_s12 = smov 0   ;;  %s729_s13 = smov 0  }
   0x4   :  { %s731_s14 = smov 0   ;;  %s733_s15 = smov 0  }
   0x5 LB: > { %s748_s16 = sadd.s32 4294967295, %s685_s15   ;;  %s473_s17 = sadd.s32 4294967294, %s685_s15   ;;  %s685_s15 = sphi %s733_s15, %s981_s15   ;;  %s681_s14 = sphi %s731_s14, %s980_s14   ;;  %s677_s13 = sphi %s729_s13, %s979_s13   ;;  %s673_s12 = sphi %s727_s12, %s978_s12  }
   0x6   : > { %s752_s18 = sadd.s32 1, %s685_s15   ;;  %s26_s19 = sadd.s32 1, %s681_s14 }
   0x7   : > { %s23_s20 = ssub.s32 %s685_s15, %s752_s18  ;;  %p33_p0 = scmp.ne.s32.totalorder %s681_s14, %s677_s13 }
   0x8   : > { %p24_p1 = scmp.eq.s32.totalorder %s23_s20, 0  ;;  %p34_p2 = scmp.eq.s32.totalorder %s685_s15, 0 }
   0x9   : > { %p39_p3 = scmp.ne.s32.totalorder %s677_s13, %s673_s12  ;;  %p40_p4 = scmp.eq.s32.totalorder %s748_s16, 0 }
   0xa   : > { %s764_s21 = scalar_select %p24_p1, %s681_s14, %s26_s19  }
   0xb   : > { %p766_p5 = por %p34_p2, %p33_p0  ;;  %p770_p6 = por %p40_p4, %p39_p3 }
   0xc   : > { %p105_p7 = scmp.eq.s32.totalorder %s748_s16, 1  ;;  %p111_p8 = scmp.eq.s32.totalorder %s473_s17, 1 }
   0xd   : > { %p510_p10 = scmp.lt.s32.totalorder %s685_s15, 2  ;;  %s137_s26 = sand.u32 1, %s681_s14  }
   0xe   : > { %p777_p11 = por %p105_p7, %p33_p0  ;;  %p781_p12 = por %p111_p8, %p39_p3 }
   0xf   : > { %s477_s27 = sshll.u32 %s685_s15, 7  ;;  %s476_s28 = sshll.u32 %s137_s26, 3 }
  0x10   : > { %s969_s24 = scalar_select %p777_p11, 1, 0 }
  0x11   : > { %s970_s25 = scalar_select %p781_p12, 1, 0 }
  0x12   : > { %s790_s4 = scalar_lea.hbm %s962_s0, %s477_s27  ;;  %s141_s5 = scalar_lea.vmem [#allocation8], %s476_s28 }
  0x13   : > { %s148_s6 = sshll.u32 %s141_s5, 4  ;;  %p794_p13 = pnand %p510_p10, %p766_p5  ;;  %s798_s6 = int_to_ptr.vmem [resolvable:$true] %s148_s6 }
  0x14   : > { %s138_s8 = scalar_lea.sflag [#allocation9], %s137_s26  ;;  %s577_s9 = scalar_lea.hbm %s790_s4, 128 }
  0x15   : > { %p578_p2 = scmp.ne.s32.totalorder %s790_s4, %s577_s9  ;;  %p579_p3 = pneg %p794_p13 }
  0x16   : > { %s582_s17 = scalar_lea.hbm %s962_s0, 256  ;;  %p583_p5 = scmp.lt.u32.totalorder %s790_s4, %s962_s0 }
  0x17   : > { %p580_p4 = pnand %p579_p3, %p578_p2  ;;  %p584_p8 = scmp.lt.u32.totalorder %s582_s17, %s577_s9 }
  0x18   : > { %p586_p9 = scmp.lt.u32.totalorder %s577_s9, %s790_s4 }
  0x19   : > { %p581_p7 = pneg %p580_p4  ;;  %p585_p10 = por %p584_p8, %p583_p5 }
  0x1b   : > { %p587_p0 = por %p586_p9, %p585_p10 }
  0x1d   : > { %p588_p1 = pnand %p587_p0, %p581_p7 }
  0x1f   : > { %591 = shalt.err (!%p588_p1)
}
  0x20   : > { %s592_s22 = scalar_lea.vmem %s798_s6, 128  ;;  %s699_s26 = smov [#allocation8]  }
  0x21   : > { %p593_p2 = scmp.ne.s32.totalorder %s798_s6, %s592_s22  ;;  %s597_s27 = sshll.u32 %s699_s26, 4  ;;  %s598_s27 = int_to_ptr.vmem [resolvable:$false] %s597_s27 }
  0x22   : > { %s599_s28 = scalar_lea.vmem %s598_s27, 256  ;;  %p600_p11 = scmp.lt.s32.totalorder %s798_s6, %s598_s27 }
  0x23   : > { %p595_p4 = pnand %p593_p2, %p579_p3  ;;  %p601_p5 = scmp.lt.s32.totalorder %s599_s28, %s592_s22 }
  0x25   : > { %p596_p12 = pneg %p595_p4  ;;  %p602_p8 = por %p601_p5, %p600_p11 }
  0x27   : > { %p603_p9 = pnand %p602_p8, %p596_p12 }
  0x29   : > { %606 = shalt.err (!%p603_p9)
}
  0x2a   : > { %505 = dma.hbm_to_vmem [thread:$0]  (!%p794_p13), %s790_s4, 128, %s798_s6, %s138_s8  }
  0x2b   : > { %p972_p0 = scmp.lt.s32.totalorder %s685_s15, 3  ;;  %p973_p1 = scmp.ge.s32.totalorder %s685_s15, 1 }
  0x2d   : > { %p154_p3 = pnand %p973_p1, %p972_p0 }
  0x2e   : > { %s832_s29 = sand.u32 (!%p154_p3), 1, %s677_s13  }
  0x2f   : > { %157 = sbr.rel (%p154_p3) target bundleno = 399 (0x18f), region = 32  ;;  %s479_s30 = sshll.u32 (!%p154_p3), %s832_s29, 3 }
  0x30   : > { %s160_s5 = scalar_lea.sflag (!%p154_p3), [#allocation9], %s832_s29  ;;  %s836_s9 = scalar_lea.vmem (!%p154_p3), [#allocation8], %s479_s30 }
  0x36   : > { %664 = dma.done.wait (%p770_p6), %s160_s5, 128  }
  0x37   : > { %666 = vsyncadd (%p770_p6), %s160_s5, 4294967168  ;;  %s842_s4 = scalar_lea.vmem [#allocation11], %s479_s30  ;;  %p481_p11 = scmp.ne.s32.totalorder %s748_s16, 0 }
  0x38   : > { %v700_v0 = vmov (!%p481_p11), 0.0   ;;  %v701_v1 = vmov (!%p481_p11), 1.0  }
  0x39   : > { %189 = sbr.rel (%p481_p11) target bundleno = 64 (0x40), region = 40  ;;  %190 = vst [vmem:[#allocation6] sm:$0x3] (!%p481_p11), %v700_v0  ;;  %191 = vst [vmem:[#allocation7] sm:$0x1] (!%p481_p11), %v701_v1 }
  0x40 PF: > { %v192_v2 = vld [vmem:[%s836_s9] sm:$0xff]  ;;  %v849_v3 = vld [vmem:[%s964_s2] sm:$0x1]  ;;  %v202_v4 = vlaneseq  ;;  %vm225_vm0 = vcmask 1024   ;;  %s865_s10 = sshll.u32 %s748_s16, 3  ;;  %vm198_vm1 = vcmask 7168  }
  0x41   : > { %v854_v5 = vld [vmem:[%s963_s1] sm:$0x1]  ;;  %v193_v6 = vmul.f32 %v192_v2, %v192_v2  ;;  %v211_v8 = vmul.f32 %v849_v3, %v849_v3  ;;  %s234_s11 = ssub.s32 0, %s865_s10  ;;  %p233_p6 = scmp.lt.s32.totalorder %s865_s10, 0  ;;  %v223_v24 = vld [vmem:[#allocation7] sm:$0x1]  }
  0x42   : > { %v203_v7 = vshrl.u32 %v202_v4, 7  ;;  %v200_v9 = vmul.f32 %v854_v5, %v854_v5  ;;  %v224_v15 = vld [vmem:[#allocation6] sm:$0x3]  ;;  %s483_s17 = smin.u32 %s865_s10, %s234_s11  ;;  %s874_s27 = smov 0  }
  0x43   : > { %196 = vadd.xlane.f32.xlu0 %v193_v6  ;;  %v226_v16 = vsel %vm225_vm0, %v224_v15, 0.0  ;;  %s236_s19 = sand.u32 1, %s483_s17  }
  0x44   : > { %v860_v10 = vsub.s32 0, %v203_v7  ;;  %v227_v17 = vrot.slane %v226_v16, 4  ;;  %s237_s20 = ssub.s32 0, %s236_s19 }
  0x45   : > { %s983_s20 = smov (!%p233_p6, %s237_s20), %s236_s19 }
  0x46   : > { %v216_v11 = vrot.slane %v211_v8, %v860_v10  ;;  %v205_v12 = vrot.slane %v200_v9, %v860_v10  ;;  %v228_v18 = vadd.f32 %v227_v17, %v226_v16  ;;  %p485_p12 = scmp.lt.s32.totalorder %s983_s20, 0  ;;  %s243_s22 = sadd.s32 2, %s983_s20 }
  0x48   : > { %v218_v13 = vmul.f32 %v216_v11, %v193_v6  ;;  %v207_v14 = vmul.f32 %v205_v12, %v193_v6  ;;  %v229_v19 = vrot.slane %v228_v18, 2  ;;  %s985_s22 = smov (!%p485_p12, %s243_s22), %s983_s20 }
  0x49   : > { %s245_s26 = scalar_lea.vmem [#allocation6], %s985_s22 }
  0x4a   : > { %219 = vadd.xlane.f32.xlu1 %v218_v13  ;;  %208 = vadd.xlane.f32.xlu0 %v207_v14  ;;  %v230_v20 = vadd.f32 %v229_v19, %v228_v18  ;;  %v246_v23 = vld [vmem:[%s245_s26] sm:$0x1] }
  0x4c   : > { %v231_v21 = vrot.slane %v230_v20, 1 }
  0x4e   : > { %v232_v22 = vadd.f32 %v231_v21, %v230_v20 }
  0x50   : > { %v247_v25 = vsub.f32 %v232_v22, %v246_v23  }
  0xd0   : > { %v197_v26 = vpop.xlane.xlu0 %196 }
  0xd1   : > { %199 = vst.msk [vmem:[#allocation2] sm:$0xff] %vm198_vm1, %v197_v26 }
  0xd7   : > { %v220_v27 = vpop.xlane.xlu1 %219  ;;  %v209_v28 = vpop.xlane.xlu0 %208 }
  0xd8   : > { %221 = vst.msk [vmem:[#allocation4] sm:$0xff] %vm198_vm1, %v220_v27  ;;  %210 = vst.msk [vmem:[#allocation3] sm:$0xff] %vm198_vm1, %v209_v28 }
  0xd9 LB: >> { %v702_v29 = vmov 0   ;;  %s883_s28 = sadd.s32 %s697_s27, %s865_s10  ;;  %s257_s30 = scalar_lea.vmem [#allocation2], %s697_s27  ;;  %v278_v32 = vmul.f32 %v693_v24, %v693_v24  ;;  %v703_v39 = vmov 0.0   ;;  %v704_v44 = vmov 1.0   ;;  %s697_s27 = sphi %s874_s27, %s253_s27   ;;  %v693_v24 = vphi %v223_v24, %v974_v24   ;;  %v689_v25 = vphi %v247_v25, %v351_v25  }
  0xda   : >> { %575 = vset.pattern.permute.xlu1 %v702_v29  ;;  %574 = vset.pattern.permute.xlu0 %v702_v29  ;;  %v258_v30 = vld [vmem:[%s257_s30] sm:$0x1]  ;;  %p283_p13 = scmp.ge.s32.totalorder %s883_s28, 1  ;;  %p284_p7 = scmp.lt.s32.totalorder %s883_s28, 16 }
  0xdb   : >> { %v279_v31 = vadd.f32 %v689_v25, %v258_v30  ;;  %s263_s5 = sadd.s32 1, %s883_s28  ;;  %s261_s19 = scalar_lea.vmem [#allocation4], %s697_s27 }
  0xdc   : >> { %p285_p10 = pnand %p284_p7, %p283_p13  ;;  %p264_p2 = scmp.lt.s32.totalorder %s263_s5, 0 }
  0xdd   : >> { %v280_v33 = vmul.f32 0.00390625, %v279_v31  ;;  %s265_s6 = ssub.s32 0, %s263_s5  ;;  %s259_s20 = scalar_lea.vmem [#allocation3], %s697_s27 }
  0xde   : >> { %s489_s7 = scalar_select %p285_p10, 0, 1 }
  0xdf   : >> { %v281_v34 = vadd.f32 1e-10, %v280_v33  ;;  %s486_s23 = smin.u32 %s265_s6, %s263_s5  ;;  %v262_v38 = vld [vmem:[%s261_s19] sm:$0x1]  ;;  %s337_s26 = ssub.s32 0, %s883_s28 }
  0xe0   : >> { %v289_v35 = vstv %s489_s7  ;;  %s267_s8 = sand.u32 1, %s486_s23   ;;  %v260_v42 = vld [vmem:[%s259_s20] sm:$0x1]  ;;  %s490_s30 = smin.u32 %s337_s26, %s883_s28 }
  0xe1   : >> { %vm290_vm2 = vcmp.eq.s32.totalorder %v289_v35, 1  ;;  %v282_v36 = vmul.f32 %v281_v34, %v278_v32  ;;  %s268_s11 = ssub.s32 0, %s267_s8  ;;  %s339_s5 = sand.u32 1, %s490_s30  }
  0xe2   : >> { %v302_v37 = vsel %vm290_vm2, %v693_v24, 1.0  ;;  %s987_s11 = smov (!%p264_p2, %s268_s11), %s267_s8  ;;  %p336_p5 = scmp.lt.s32.totalorder %s883_s28, 0 }
  0xe3   : >> { %317 = vperm.xlu1 %575, %v302_v37   ;;  %vm287_vm3 = vcmp.lt.f32.partialorder %v282_v36, 0.004466836  ;;  %vm292_vm4 = vcmp.gt.f32.partialorder %v282_v36, 0.0056234132  ;;  %p488_p4 = scmp.lt.s32.totalorder %s987_s11, 0  ;;  %s274_s17 = sadd.s32 2, %s987_s11 }
  0xe4   : >> { %vm291_vm5 = vmand %vm290_vm2, %vm287_vm3  ;;  %s340_s6 = ssub.s32 0, %s339_s5  ;;  %s325_s23 = scalar_lea.vmem [#allocation5], %s697_s27 }
  0xe5   : >> { %vm293_vm6 = vmand %vm290_vm2, %vm292_vm4  ;;  %s989_s17 = smov (!%p488_p4, %s274_s17), %s987_s11  ;;  %s991_s6 = smov (!%p336_p5, %s340_s6), %s339_s5 }
  0xe6   : >> { %v294_v40 = vsel %vm293_vm6, -2.0, %v703_v39  ;;  %s276_s22 = scalar_lea.vmem [#allocation6], %s989_s17  ;;  %p492_p8 = scmp.lt.s32.totalorder %s991_s6, 0 }
  0xe7   : >> { %v295_v41 = vsel %vm291_vm5, 2.0, %v294_v40  ;;  %v277_v47 = vld [vmem:[%s276_s22] sm:$0x1]  ;;  %s346_s7 = sadd.s32 2, %s991_s6  ;;  %s253_s27 = sadd.s32 1, %s697_s27  }
  0xe8   : >> { %vm297_vm7 = vcmp.lt.f32.partialorder %v295_v41, 0.0  ;;  %vm296_vm8 = vcmp.gt.f32.partialorder %v295_v41, 0.0  ;;  %v350_v50 = vsub.f32 %v689_v25, %v277_v47  ;;  %s993_s7 = smov (!%p492_p8, %s346_s7), %s991_s6  ;;  %p250_p9 = scmp.ge.s32.totalorder %s253_s27, 8  }
  0xe9   : >> { %v303_v43 = vsel %vm297_vm7, 1, %v702_v29  ;;  %v352_v45 = vsel %vm297_vm7, 0.7943282, %v704_v44  ;;  %v298_v46 = vsel %vm297_vm7, %v262_v38, %v258_v30  ;;  %v309_v51 = vsel %vm296_vm8, 1, %v702_v29  ;;  %s348_s28 = scalar_lea.vmem [#allocation6], %s993_s7  ;;  %v365_v0 = vld [vmem:[%s836_s9] sm:$0xff] (%p250_p9) }
  0xea   : >> { %305 = vperm.xlu0 %574, %v303_v43   ;;  %v353_v48 = vsel %vm296_vm8, 1.2589254, %v352_v45  ;;  %v299_v49 = vsel %vm296_vm8, %v260_v42, %v298_v46  ;;  %v705_v2 = vmov (%p250_p9), 0   ;;  %s495_s8 = sshll.u32 (%p250_p9), %s748_s16, 7  ;;  %s385_s11 = sshll.u32 (%p250_p9), %s842_s4, 4  ;;  %s918_s11 = int_to_ptr.vmem [resolvable:$true] %s385_s11 }
  0xeb   : >> { %v354_v52 = vmul.f32 %v693_v24, %v353_v48   ;;  %v300_v53 = vmul.f32 %v299_v49, %v278_v32  ;;  %s916_s27 = scalar_lea.hbm (%p250_p9), %s965_s3, %s495_s8  ;;  %s372_s9 = scalar_lea.sflag (%p250_p9), [#allocation10], %s832_s29 }
  0xec   : > { %s607_s10 = scalar_lea.vmem (%p250_p9), %s918_s11, 128  ;;  %p975_p1 = scmp.ne.s32.totalorder (%p250_p9), %s969_s24, 0 }
  0xed   : >> { %v301_v54 = vsel %vm290_vm2, %v300_v53, %v258_v30  ;;  %v974_v24 = vmov %v354_v52  ;;  %p608_p0 = scmp.ne.s32.totalorder (%p250_p9), %s918_s11, %s607_s10  ;;  %s706_s16 = smov (%p250_p9), [#allocation11]  }
  0xee   : >> { %311 = vperm.xlu0 %574, %v309_v51   ;;  %329 = vperm.xlu1 %575, %v301_v54   ;;  %v351_v25 = vadd.f32 %v350_v50, %v301_v54   ;;  %s611_s20 = sshll.u32 (%p250_p9), %s706_s16, 4  ;;  %s612_s20 = int_to_ptr.vmem [resolvable:$false] %s611_s20 }
  0xef   : > { %p609_p3 = pnand (%p250_p9), %p608_p0, %p975_p1  ;;  %s613_s22 = scalar_lea.vmem (%p250_p9), %s612_s20, 256 }
  0xf0   : > { %p614_p6 = scmp.lt.s32.totalorder (%p250_p9), %s918_s11, %s612_s20  ;;  %p615_p12 = scmp.lt.s32.totalorder (%p250_p9), %s613_s22, %s607_s10 }
  0xf1   : > { %p610_p11 = pneg (%p250_p9), %p609_p3 }
  0xf2   : > { %576 = vset.pattern.permute.xlu0 (%p250_p9), %v705_v2  ;;  %p616_p13 = por (%p250_p9), %p615_p12, %p614_p6 }
  0xf3   : > { %357 = vperm.xlu0 (%p250_p9), %576, %v354_v52  }
  0xf4   : > { %p617_p7 = pnand (%p250_p9), %p616_p13, %p610_p11 }
 0x162   : >> { %v318_v55 = vpop.permute.xlu1 %317 }
 0x163   : >> { %v323_v59 = vrot.slane %v318_v55, %v860_v10 }
 0x169   : >> { %v306_v56 = vpop.permute.xlu0 %305 }
 0x16a   : >> { %vm307_vm9 = vcmp.eq.s32.totalorder %v306_v56, 1 }
 0x16b   : >> { %v308_v60 = vsel %vm307_vm9, %v849_v3, 1.0 }
 0x16c   : > { %252 = sbr.rel (!%p250_p9) target bundleno = 217 (0xd9), region = 95 }
 0x16d   : >> { %v312_v57 = vpop.permute.xlu0 %311  ;;  %v330_v58 = vpop.permute.xlu1 %329 }
 0x16e   : >> { %vm313_vm10 = vcmp.eq.s32.totalorder %v312_v57, 1  ;;  %v335_v61 = vrot.slane %v330_v58, %v860_v10 }
 0x16f   : >> { %v314_v62 = vsel %vm313_vm10, %v854_v5, %v308_v60 }
 0x170   : >> { %v324_v63 = vmul.f32 %v323_v59, %v314_v62  ;;  %349 = vst [vmem:[%s348_s28] sm:$0x1] %v335_v61 }
 0x172   : >> { %326 = vst [vmem:[%s325_s23] sm:$0x1] %v324_v63 }
 0x179   : > { %v366_v1 = vld [vmem:[#allocation5] sm:$0xff] }
 0x17a   : > { %v367_v4 = vmul.f32 %v366_v1, %v365_v0 }
 0x17c   : > { %v493_v6 = vclamps-f32 %v367_v4, 1.0 }
 0x17e   : > { %370 = vst [vmem:[%s842_s4] sm:$0xff] %v493_v6 }
 0x17f   : > { %620 = shalt.err (!%p617_p7)
}
 0x180   : > { %s621_s29 = scalar_lea.hbm %s916_s27, 128  ;;  %s625_s30 = scalar_lea.hbm %s965_s3, 256 }
 0x181   : > { %p622_p10 = scmp.ne.s32.totalorder %s916_s27, %s621_s29  ;;  %p626_p5 = scmp.lt.u32.totalorder %s916_s27, %s965_s3 }
 0x182   : > { %p627_p8 = scmp.lt.u32.totalorder %s625_s30, %s621_s29  ;;  %p629_p0 = scmp.lt.u32.totalorder %s621_s29, %s916_s27 }
 0x183   : > { %p623_p2 = pnand %p622_p10, %p975_p1 }
 0x184   : > { %p628_p9 = por %p627_p8, %p626_p5 }
 0x185   : > { %p624_p4 = pneg %p623_p2 }
 0x186   : > { %p630_p3 = por %p629_p0, %p628_p9 }
 0x188   : > { %p631_p11 = pnand %p630_p3, %p624_p4 }
 0x18a   : > { %634 = shalt.err (!%p631_p11)
}
 0x18b   : > { %500 = dma.vmem_to_hbm [thread:$0]  (%p975_p1), %s918_s11, 128, %s916_s27, %s372_s9   ;;  %v358_v3 = vpop.permute.xlu0 %357 }
 0x18c   : > { %v363_v5 = vrot.slane %v358_v3, %v860_v10 }
 0x18e   : > { %364 = vst [vmem:[#allocation7] sm:$0x1] %v363_v5 }
 0x18f PF: > { %s397_s7 = sand.u32 1, %s673_s12   ;;  %p976_p6 = scmp.ne.s32.totalorder %s970_s25, 0 }
 0x190   : > { %p977_p12 = scmp.ge.s32.totalorder %s685_s15, 2  ;;  %s398_s28 = scalar_lea.sflag [#allocation10], %s397_s7 }
 0x192   : > { %p507_p13 = pnand %p977_p12, %p976_p6 }
 0x194   : > { %668 = dma.done.wait (!%p507_p13), %s398_s28, 128  }
 0x195   : > { %670 = vsyncadd (!%p507_p13), %s398_s28, 4294967168  ;;  %p16_p1 = scmp.ge.s32.totalorder %s752_s18, 4   ;;  %s978_s12 = smov %s677_s13 }
 0x196   : > { %s979_s13 = smov %s681_s14  ;;  %s980_s14 = smov %s764_s21 }
 0x197   : > { %s981_s15 = smov %s752_s18  ;;  %18 = sbr.rel (!%p16_p1) target bundleno = 5 (0x5), region = 106 }
 0x19e   :  { %403 = vsyncpa [#allocation9], 1 }
 0x19f   :  { %405 = vsyncpa [#allocation9 + $0x1], 1 }
 0x1a0   :  { %406 = vsyncpa [#allocation10], 1 }
 0x1a1   :  { %408 = vsyncpa [#allocation10 + $0x1], 1 }

</bundles_post_ra>
